<compile_context>
chip_gen: v6e
topology: v6e:2x2x1
jax: 0.10.0
libtpu: 0.0.40
codegen_flags: <defaults>
</compile_context>

<pallas_src>
import functools

import jax
import jax.numpy as jnp
from jax import lax
from jax.experimental import pallas as pl
from jax.experimental.pallas import tpu as pltpu


_LANE = 128
_SUBLANE = 8


def _sumsq_kernel(x_ref, acc_ref, *, rows, tile_rows, steps_per_core, needs_mask):
    """Per-core running sum-of-squares into a resident (8, 128) f32 output.

    x_ref   : VMEM (tile_rows, 128) block of the flattened input
    acc_ref : VMEM (8, 128) f32 per-core accumulator (output block, revisited
              across the "arbitrary" step axis)
    """
    s = pl.program_id(1)

    @pl.when(s == 0)
    def _():
        acc_ref[...] = jnp.zeros_like(acc_ref)

    x = x_ref[...].astype(jnp.float32)

    def accumulate(xv):
        xx = xv * xv
        if tile_rows % _SUBLANE == 0:
            # Reduce only along the vreg-crossing (leading) axis: pure VPU adds
            # into the (8, 128) vector accumulator.  No per-step XLU reduce.
            acc_ref[...] += xx.reshape(
                tile_rows // _SUBLANE, _SUBLANE, _LANE
            ).sum(axis=0)
        else:
            # Tiny single-block input whose row count is not 8-aligned.
            acc_ref[0:1, :] += xx.sum(axis=0, keepdims=True)

    if needs_mask:
        # Global starting row of this (core, step); the last (and any
        # fully-out-of-range) steps mask rows beyond the array.
        start = (pl.program_id(0) * steps_per_core + s) * tile_rows
        is_ragged = start + tile_rows > rows

        @pl.when(jnp.logical_not(is_ragged))
        def _():
            accumulate(x)

        @pl.when(is_ragged)
        def _():
            row = start + lax.broadcasted_iota(jnp.int32, x.shape, 0)
            accumulate(jnp.where(row < rows, x, 0.0))
    else:
        accumulate(x)


def regularizer_forward(grad, lamb, *, block_bytes=4 * 1024 * 1024):
    """lamb * Frobenius-norm(grad), computed with a Pallas TPU kernel."""
    orig_dtype = grad.dtype
    flat = grad.reshape(-1)                 # metadata-only for contiguous arrays
    total = flat.shape[0]
    lamb_f32 = jnp.asarray(lamb, jnp.float32)

    # Elements that do not fill a full 128-lane row are reduced in plain JAX
    # (touches < 512 bytes) and folded into the final sqrt below.
    bulk = (total // _LANE) * _LANE
    if bulk < total:
        tail = flat[bulk:].astype(jnp.float32)
        tail_sq = jnp.sum(tail * tail)
    else:
        tail_sq = jnp.float32(0.0)

    if bulk == 0:
        # Tensor smaller than one lane row: nothing for the kernel to do.
        return (lamb_f32 * jnp.sqrt(tail_sq)).astype(orig_dtype)

    # Zero-copy when total % 128 == 0; otherwise the slice materializes (see
    # module docstring note) -- supply 128-aligned sizes for peak bandwidth.
    x2d = (flat if bulk == total else flat[:bulk]).reshape(-1, _LANE)
    rows = x2d.shape[0]

    itemsize = jnp.dtype(orig_dtype).itemsize
    # dtype-aware sublane granularity: f32 -> 8, bf16 -> 16, int8/fp8 -> 32.
    sublane = _SUBLANE * max(1, 4 // max(1, itemsize))

    # Byte-budget tile: ~block_bytes per block, rounded to sublane granularity.
    tile_rows = max(sublane, block_bytes // (_LANE * itemsize))
    tile_rows = max(sublane, (tile_rows // sublane) * sublane)
    if rows <= tile_rows:
        # Single block covering the full array (always a legal block shape).
        tile_rows = rows

    steps_total = pl.cdiv(rows, tile_rows)
    # v7x: split the row range across the two TensorCores via a leading
    # "parallel" grid axis.  On single-TC v5e/v6e this is a serial loop of 2.
    num_cores = 2 if steps_total >= 2 else 1
    steps_per_core = pl.cdiv(steps_total, num_cores)
    needs_mask = (num_cores * steps_per_core * tile_rows) != rows
    last_block = steps_total - 1

    if num_cores * steps_per_core == steps_total:
        data_map = lambda c, s: (c * steps_per_core + s, 0)
    else:
        # Clamp fully-out-of-range steps to the last block; the kernel masks
        # their contribution to zero.
        data_map = lambda c, s: (
            jnp.minimum(c * steps_per_core + s, last_block),
            0,
        )

    kernel = functools.partial(
        _sumsq_kernel,
        rows=rows,
        tile_rows=tile_rows,
        steps_per_core=steps_per_core,
        needs_mask=needs_mask,
    )

    partials = pl.pallas_call(
        kernel,
        out_shape=jax.ShapeDtypeStruct((num_cores, _SUBLANE, _LANE), jnp.float32),
        grid_spec=pltpu.PrefetchScalarGridSpec(
            num_scalar_prefetch=0,
            grid=(num_cores, steps_per_core),
            in_specs=[pl.BlockSpec((tile_rows, _LANE), data_map)],
            out_specs=pl.BlockSpec(
                (None, _SUBLANE, _LANE), lambda c, s: (c, 0, 0)
            ),
        ),
        compiler_params=pltpu.CompilerParams(
            dimension_semantics=("parallel", "arbitrary"),
        ),
        cost_estimate=pl.CostEstimate(
            flops=2 * total,
            transcendentals=0,
            bytes_accessed=total * itemsize,
        ),
    )(x2d)

    # Combine per-core partial sums, tail, sqrt and lamb scale (2048-element
    # reduce -- negligible next to the HBM stream).
    total_sq = jnp.sum(partials) + tail_sq
    return (lamb_f32 * jnp.sqrt(total_sq)).astype(orig_dtype)


def _ref(grad, lamb):
    g = grad.astype(jnp.float32)
    return (jnp.float32(lamb) * jnp.sqrt(jnp.sum(g * g))).astype(grad.dtype)


if __name__ == "__main__":
    key = jax.random.PRNGKey(0)
    k1, k2, k3, k4 = jax.random.split(key, 4)
    lamb = 0.1

    checks = []

    # 1) canonical small NCHW gradient (single block path).
    g1 = jax.random.normal(k1, (2, 4, 16, 16), jnp.float32)
    checks.append((regularizer_forward(g1, lamb), _ref(g1, lamb), 1e-5))

    # 2) multi-step, 2-"core" grid (aligned tiles, accumulator across steps).
    g2 = jax.random.normal(k2, (4, 8, 32, 32), jnp.float32)
    checks.append(
        (regularizer_forward(g2, lamb, block_bytes=64 * 512), _ref(g2, lamb), 1e-5)
    )

    # 3) ragged / clamped blocks: 36 rows over tile_rows=8, split on 2 cores.
    g3 = jax.random.normal(k3, (36, 128), jnp.float32)
    checks.append(
        (regularizer_forward(g3, lamb, block_bytes=8 * 512), _ref(g3, lamb), 1e-5)
    )

    # 4) single block whose row count is not 8-aligned (fallback reduce path).
    g3b = jax.random.normal(k3, (36, 128), jnp.float32)
    checks.append((regularizer_forward(g3b, lamb), _ref(g3b, lamb), 1e-5))

    # 5) odd total size: <128-element tail folded in on the wrapper side.
    g4 = jax.random.normal(k4, (17, 181), jnp.float32)
    checks.append((regularizer_forward(g4, lamb), _ref(g4, lamb), 1e-5))

    # 6) bf16 input (dtype-scaled tile rows, f32 accumulation).
    g5 = jax.random.normal(k1, (2, 4, 16, 16), jnp.float32).astype(jnp.bfloat16)
    checks.append((regularizer_forward(g5, lamb), _ref(g5, lamb), 2e-2))

    for got, want, tol in checks:
        got = jax.block_until_ready(got)
        assert jnp.allclose(
            jnp.float32(got), jnp.float32(want), rtol=tol, atol=tol
        ), (got, want)

    print("KERNEL_OK")
</pallas_src>

<mosaic_0001>
module attributes {stable_mosaic.version = 11 : i64} {
  func.func @_sumsq_kernel(%arg0: i32, %arg1: i32, %arg2: memref<16x128xf32, #tpu.memory_space<vmem>>, %arg3: memref<1x8x128xf32, #tpu.memory_space<vmem>>) attributes {dimension_semantics = [#tpu.dimension_semantics<parallel>, #tpu.dimension_semantics<arbitrary>], iteration_bounds = array<i64: 1, 1>, scalar_prefetch = 0 : i64, scratch_operands = 0 : i64, tpu.core_type = #tpu.core_type<tc>, window_params = [{transform_indices = @transform_0, window_bounds = array<i64: 16, 128>}, {transform_indices = @transform_1, window_bounds = array<i64: 1, 8, 128>}]} {
    %c0_i32 = arith.constant 0 : i32
    %0 = arith.cmpi eq, %arg1, %c0_i32 : i32
    %1 = arith.extui %0 : i1 to i32
    %c0_i32_0 = arith.constant 0 : i32
    %2 = arith.cmpi ne, %1, %c0_i32_0 : i32
    scf.if %2 {
      %cst_8 = arith.constant 0.000000e+00 : f32
      %13 = vector.broadcast %cst_8 : f32 to vector<8x128xf32>
      %c0_9 = arith.constant 0 : index
      %c0_10 = arith.constant 0 : index
      %c0_11 = arith.constant 0 : index
      %14 = vector.load %arg3[%c0_9, %c0_10, %c0_11] : memref<1x8x128xf32, #tpu.memory_space<vmem>>, vector<1x8x128xf32>
      %15 = vector.shape_cast %14 : vector<1x8x128xf32> to vector<8x128xf32>
      %16 = vector.shape_cast %13 : vector<8x128xf32> to vector<1x8x128xf32>
      tpu.vector_store %arg3[%c0_9, %c0_10, %c0_11], %16 {strides = array<i32>} : memref<1x8x128xf32, #tpu.memory_space<vmem>>, vector<1x8x128xf32>,
    } else {
    }
    %c0 = arith.constant 0 : index
    %c0_1 = arith.constant 0 : index
    %3 = vector.load %arg2[%c0, %c0_1] : memref<16x128xf32, #tpu.memory_space<vmem>>, vector<16x128xf32>
    %4 = arith.mulf %3, %3 : vector<16x128xf32>
    %c0_2 = arith.constant 0 : index
    %c0_3 = arith.constant 0 : index
    %c0_4 = arith.constant 0 : index
    %5 = vector.load %arg3[%c0_2, %c0_3, %c0_4] : memref<1x8x128xf32, #tpu.memory_space<vmem>>, vector<1x8x128xf32>
    %6 = vector.shape_cast %5 : vector<1x8x128xf32> to vector<8x128xf32>
    %7 = vector.shape_cast %4 : vector<16x128xf32> to vector<2x8x128xf32>
    %cst = arith.constant dense<0.000000e+00> : vector<8x128xf32>
    %8 = vector.multi_reduction <add>, %7, %cst [0] : vector<2x8x128xf32> to vector<8x128xf32>
    %9 = arith.addf %6, %8 : vector<8x128xf32>
    %c0_5 = arith.constant 0 : index
    %c0_6 = arith.constant 0 : index
    %c0_7 = arith.constant 0 : index
    %10 = vector.load %arg3[%c0_5, %c0_6, %c0_7] : memref<1x8x128xf32, #tpu.memory_space<vmem>>, vector<1x8x128xf32>
    %11 = vector.shape_cast %10 : vector<1x8x128xf32> to vector<8x128xf32>
    %12 = vector.shape_cast %9 : vector<8x128xf32> to vector<1x8x128xf32>
    tpu.vector_store %arg3[%c0_5, %c0_6, %c0_7], %12 {strides = array<i32>} : memref<1x8x128xf32, #tpu.memory_space<vmem>>, vector<1x8x128xf32>,
    return
  }
  func.func @transform_0(%arg0: i32, %arg1: i32) -> (i32, i32) {
    %c1_i32 = arith.constant 1 : i32
    %0 = arith.muli %arg0, %c1_i32 : i32
    %1 = arith.addi %0, %arg1 : i32
    %c0_i32 = arith.constant 0 : i32
    %c0_i32_0 = arith.constant 0 : i32
    return %1, %c0_i32 : i32, i32
  }
  func.func @transform_1(%arg0: i32, %arg1: i32) -> (i32, i32, i32) {
    %c0_i32 = arith.constant 0 : i32
    %c0_i32_0 = arith.constant 0 : i32
    %c0_i32_1 = arith.constant 0 : i32
    return %arg0, %c0_i32, %c0_i32_0 : i32, i32, i32
  }
}

</mosaic_0001>

<bundles_post_ra>
// kernel: tpu_custom_call.1
= control target key start
LH: loop header
LB: loop body
LE: loop exit
PB: predicated region body
PF: predicated region fallthrough
CT: control target
= control target key end

     0   :  { %6 = vsyncpa [#allocation3], 0  ;;  %s126_s0 = inlined_call_operand.hbm [shape: f32[16,128], index: 0, kind: input, shape index: {}]   ;;  %s127_s1 = inlined_call_operand.hbm [shape: f32[1,8,128], index: 1, kind: output, shape index: {}]  }
   0x1   :  { %7 = vsyncpa [#allocation4], 0  ;;  %s106_s6 = smov [#allocation2]  }
   0x2   :  { %s17_s7 = sshll.u32 %s106_s6, 4  ;;  %s18_s7 = int_to_ptr.vmem [resolvable:$true] %s17_s7 }
   0x3   :  { %s70_s8 = scalar_lea.vmem %s18_s7, 256  ;;  %p75_p1 = scmp.lt.s32.totalorder %s18_s7, %s18_s7 }
   0x4   :  { %p71_p0 = scmp.ne.s32.totalorder %s18_s7, %s70_s8  ;;  %p76_p2 = scmp.lt.s32.totalorder %s70_s8, %s70_s8 }
   0x6   :  { %p77_p3 = por %p76_p2, %p75_p1 }
   0x8   :  { %p78_p4 = pnand %p77_p3, %p71_p0 }
   0xa   :  { %81 = shalt.err (!%p78_p4)
}
   0xb   :  { %s107_s9 = smov 128   ;;  %s108_s10 = smov 8  }
   0xc   :  { %23 = dma.hbm_to_vmem [thread:$0]  %s126_s0, 256, %s18_s7, [#allocation3], %s107_s9, %s107_s9, %s108_s10  }
   0xd   :  { %102 = dma.done.wait [#allocation3], 256  }
   0xe   :  { %103 = vsyncadd [#allocation3], 4294967040  ;;  %v34_v0 = vld [vmem:[#allocation2] sm:$0xff]  ;;  %v35_v1 = vld [vmem:[#allocation2 + $0x8] sm:$0xff]  ;;  %s109_s13 = smov [#allocation5]  }
   0xf   :  { %v36_v2 = vmul.f32 %v34_v0, %v34_v0  ;;  %v37_v3 = vmul.f32 %v35_v1, %v35_v1  ;;  %s48_s14 = sshll.u32 %s109_s13, 4  ;;  %s49_s14 = int_to_ptr.vmem [resolvable:$true] %s48_s14 }
  0x10   :  { %s82_s15 = scalar_lea.vmem %s49_s14, 128  ;;  %p87_p6 = scmp.lt.s32.totalorder %s49_s14, %s49_s14 }
  0x11   :  { %v39_v4 = vadd.f32 %v37_v3, %v36_v2  ;;  %p83_p5 = scmp.ne.s32.totalorder %s49_s14, %s82_s15  ;;  %p88_p7 = scmp.lt.s32.totalorder %s82_s15, %s82_s15 }
  0x13   :  { %41 = vst [vmem:[#allocation5] sm:$0xff] %v39_v4  ;;  %p89_p8 = por %p88_p7, %p87_p6 }
  0x15   :  { %p90_p9 = pnand %p89_p8, %p83_p5 }
  0x17   :  { %93 = shalt.err (!%p90_p9)
}
  0x18   :  { %51 = dma.vmem_to_hbm [thread:$0]  %s49_s14, 128, %s127_s1, [#allocation4]  }
  0x19   :  { %104 = dma.done.wait [#allocation4], 128  }
  0x1a   :  { %105 = vsyncadd [#allocation4], 4294967168 }
  0x1b   :  { %55 = vsyncpa [#allocation3], 1 }
  0x1c   :  { %56 = vsyncpa [#allocation4], 1 }

</bundles_post_ra>
